<compile_context>
chip_gen: v7x
topology: tpu7x:2x2x1
jax: 0.10.0
libtpu: 0.0.40
codegen_flags: <defaults>
</compile_context>

<pallas_src>
import jax
import jax.numpy as jnp
from jax.experimental import pallas as pl
from jax.experimental.pallas import tpu as pltpu

LN_EPS = 1e-5


def _hnn_kernel(x_ref, w_eff_ref, gamma_ref, beta_ref, w_out_eff_ref,
                avg_ref, ham_mat_ref, pred_ref, ham_ref):
    """One (lane-packed) batch tile of the full HNN forward.

    All feature axes are packed: P = pack * D (= 128 when D divides 128), so
    every vreg / MXU feed / predictions store is lane-dense.

    x_ref:         (TB, P)     packed input tile           (streamed)
    w_eff_ref:     (L, P, P)   block-diag antisym weights  (VMEM resident)
    gamma_ref:     (L, 1, P)   tiled LayerNorm scales      (resident)
    beta_ref:      (L, 1, P)   tiled LayerNorm biases      (resident)
    w_out_eff_ref: (P, P)      block-diag antisym out W    (resident)
    avg_ref:       (P, P)      block-diag ones/D operator  (resident)
    ham_mat_ref:   (P, pack)   0.5 * per-group indicator   (resident)
    pred_ref:      (TB, P)     packed predictions tile
    ham_ref:       (TB, pack)  per-sample Hamiltonian
    """
    x = x_ref[...].astype(jnp.float32)

    # Hamiltonian = 0.5*sum(sample^2) per D-lane group, as an MXU matmul
    # (keeps the reduction off the XLU and the VPU work lane-dense).
    ham_ref[...] = jnp.dot(x * x, ham_mat_ref[...],
                           preferred_element_type=jnp.float32)

    avg = avg_ref[...]          # hoisted load, reused across layers
    num_layers = w_eff_ref.shape[0]
    h = x
    del x                       # don't pin the input in vregs across layers

    for i in range(num_layers):                      # small static L -> unrolled
        h = jnp.dot(h, w_eff_ref[i], preferred_element_type=jnp.float32)
        h = jnp.tanh(h)
        # Segmented LayerNorm over each D-lane group (biased variance,
        # eps=1e-5, matching PyTorch). Reductions as block-diag matmuls so
        # they ride the (otherwise mostly idle) MXU instead of the XLU.
        mean = jnp.dot(h, avg, preferred_element_type=jnp.float32)
        ex2 = jnp.dot(h * h, avg, preferred_element_type=jnp.float32)
        var = ex2 - mean * mean
        inv = jax.lax.rsqrt(var + LN_EPS)
        h = (h - mean) * inv * gamma_ref[i] + beta_ref[i]

    dqdt = jnp.dot(h, w_out_eff_ref[...], preferred_element_type=jnp.float32)
    # Re-read x from the VMEM tile (cheap vld) for the residual add instead of
    # keeping the value live through the whole layer stack.
    pred_ref[...] = (x_ref[...].astype(jnp.float32) + dqdt).astype(pred_ref.dtype)


def hamiltonian_nn_forward(x, layer_weights, ln_gammas, ln_betas, w_out,
                           *, batch_tile=None, io_dtype=jnp.float32):
    """Runs the whole HNN forward pass in a single (batch-gridded) Pallas kernel.

    Args:
      x: [B, D] float input.
      layer_weights: list of [D, H] weights for the hidden HamiltonianLayers.
      ln_gammas / ln_betas: lists of [H] LayerNorm affine params.
      w_out: [H, D] final HamiltonianLayer weight.
      batch_tile: optional packed-row tile size override.
      io_dtype: dtype used to stream x / predictions through HBM. Use
        jnp.bfloat16 on v5e for very large batches (kernel math stays f32).

    Returns:
      (predictions [B, D] float32, hamiltonian [B] float32)
    """
    num_layers = len(layer_weights)
    assert num_layers >= 1, "need at least one hidden HamiltonianLayer"
    B, D = x.shape
    H = layer_weights[0].shape[1]
    assert D == H, "HamiltonianLayer (W - W.T) requires input_dim == hidden_dim"
    assert D % 2 == 0, "feature dim must be even for the q/p split"

    # --- Lane packing: pack samples per 128-lane row ------------------------
    pack = 128 // D if (D <= 128 and 128 % D == 0) else 1
    P = pack * D

    # --- Hoisted, block-diagonalized parameters (loop invariant) ------------
    eye_p = jnp.eye(pack, dtype=jnp.float32)
    w_eff = jnp.stack(
        [jnp.kron(eye_p, (w - w.T).astype(jnp.float32)) for w in layer_weights]
    )                                                                # (L, P, P)
    w_out_eff = jnp.kron(eye_p, (w_out - w_out.T).astype(jnp.float32))  # (P, P)
    gammas = jnp.stack(
        [jnp.tile(g.astype(jnp.float32).reshape(-1), pack).reshape(1, P)
         for g in ln_gammas])                                        # (L, 1, P)
    betas = jnp.stack(
        [jnp.tile(b.astype(jnp.float32).reshape(-1), pack).reshape(1, P)
         for b in ln_betas])                                         # (L, 1, P)
    # Segmented-mean operator (block-diag ones/D) and Hamiltonian operator.
    avg = jnp.kron(eye_p, jnp.full((D, D), 1.0 / D, jnp.float32))    # (P, P)
    ham_mat = 0.5 * jnp.kron(eye_p, jnp.ones((D, 1), jnp.float32))   # (P, pack)

    # --- Pad + pack the batch: (B, D) -> (Bp, P), row-major -----------------
    B_pad = ((B + pack - 1) // pack) * pack
    x_io = x.astype(io_dtype)
    if B_pad != B:
        x_io = jnp.pad(x_io, ((0, B_pad - B), (0, 0)))
    Bp = B_pad // pack
    x_packed = x_io.reshape(Bp, P)

    # --- Batch tile (packed rows) --------------------------------------------
    # Large tiles amortize the ~0.35 us / ~600 cycle per-grid-step overhead;
    # when the batch is big enough, cap the tile so there are >= 2 grid steps
    # and both v7x TensorCores get work (no-op on single-TC v5e/v6e).
    if batch_tile is None:
        batch_tile = 1024                      # == 4096 samples at pack=4
    batch_tile = min(batch_tile, Bp)
    if Bp >= 16:
        half = ((pl.cdiv(Bp, 2) + 7) // 8) * 8
        batch_tile = min(batch_tile, half)
    if batch_tile != Bp:
        batch_tile = max(8, (batch_tile // 8) * 8)
    grid = (pl.cdiv(Bp, batch_tile),)

    # --- VMEM budget & cost estimate (from actual packed sizes) --------------
    itemsize = jnp.dtype(io_dtype).itemsize
    param_bytes = 4 * (w_eff.size + gammas.size + betas.size
                       + w_out_eff.size + avg.size + ham_mat.size)
    tile_bytes = batch_tile * (2 * P * itemsize + pack * 4)   # x + pred + ham
    act_bytes = 4 * batch_tile * P * 6                        # f32 temporaries
    vmem_limit = int(min(max(2 * param_bytes + 2 * 2 * tile_bytes + act_bytes,
                             8 << 20), 48 << 20))

    cost = pl.CostEstimate(
        flops=2 * Bp * P * P * (3 * num_layers + 1)
              + 2 * Bp * P * pack
              + Bp * P * (8 * num_layers + 4),
        transcendentals=Bp * P * num_layers,                  # tanh
        bytes_accessed=itemsize * 2 * Bp * P + 4 * Bp * pack + param_bytes,
    )

    pred_packed, ham_packed = pl.pallas_call(
        _hnn_kernel,
        out_shape=(
            jax.ShapeDtypeStruct((Bp, P), io_dtype),
            jax.ShapeDtypeStruct((Bp, pack), jnp.float32),
        ),
        grid_spec=pltpu.PrefetchScalarGridSpec(
            num_scalar_prefetch=0,
            grid=grid,
            in_specs=[
                # Streamed per-tile packed input.
                pl.BlockSpec((batch_tile, P), lambda b: (b, 0)),
                # Parameters: same block every grid step -> VMEM-resident.
                pl.BlockSpec((num_layers, P, P), lambda b: (0, 0, 0)),
                pl.BlockSpec((num_layers, 1, P), lambda b: (0, 0, 0)),
                pl.BlockSpec((num_layers, 1, P), lambda b: (0, 0, 0)),
                pl.BlockSpec((P, P), lambda b: (0, 0)),
                pl.BlockSpec((P, P), lambda b: (0, 0)),
                pl.BlockSpec((P, pack), lambda b: (0, 0)),
            ],
            out_specs=[
                pl.BlockSpec((batch_tile, P), lambda b: (b, 0)),
                pl.BlockSpec((batch_tile, pack), lambda b: (b, 0)),
            ],
        ),
        compiler_params=pltpu.CompilerParams(
            dimension_semantics=("parallel",),   # batch tiles are independent
            vmem_limit_bytes=vmem_limit,
        ),
        cost_estimate=cost,
    )(x_packed, w_eff, gammas, betas, w_out_eff, avg, ham_mat)

    predictions = pred_packed.reshape(B_pad, D)[:B].astype(jnp.float32)
    hamiltonian = ham_packed.reshape(B_pad)[:B]
    return predictions, hamiltonian


def init_params(key, input_dim, hidden_dim, num_layers):
    """Deterministic init mirroring the PyTorch module's __init__ shapes."""
    layer_weights, ln_gammas, ln_betas = [], [], []
    current_dim = input_dim
    for _ in range(num_layers):
        key, sub = jax.random.split(key)
        w = jax.random.normal(sub, (current_dim, hidden_dim), jnp.float32)
        w = w / jnp.sqrt(jnp.float32(current_dim))
        layer_weights.append(w)
        # PyTorch LayerNorm defaults: weight=1, bias=0.
        ln_gammas.append(jnp.ones((hidden_dim,), jnp.float32))
        ln_betas.append(jnp.zeros((hidden_dim,), jnp.float32))
        current_dim = hidden_dim
    key, sub = jax.random.split(key)
    w_out = jax.random.normal(sub, (current_dim, input_dim), jnp.float32)
    w_out = w_out / jnp.sqrt(jnp.float32(current_dim))
    return layer_weights, ln_gammas, ln_betas, w_out


if __name__ == "__main__":
    # Small config consistent with the module. input_dim must equal hidden_dim
    # for W - W.T to be well-defined (as in the PyTorch code), and must be even
    # for the q/p split.
    batch = 8
    input_dim = 32
    hidden_dim = 32
    num_layers = 2

    key = jax.random.PRNGKey(0)
    key, xkey = jax.random.split(key)
    x = jax.random.normal(xkey, (batch, input_dim), jnp.float32)

    layer_weights, ln_gammas, ln_betas, w_out = init_params(
        key, input_dim, hidden_dim, num_layers
    )

    predictions, hamiltonian = hamiltonian_nn_forward(
        x, layer_weights, ln_gammas, ln_betas, w_out
    )
    jax.block_until_ready((predictions, hamiltonian))

    # Pure-JAX reference check of the same math.
    def ref_forward(x):
        h = x
        for w, g, b in zip(layer_weights, ln_gammas, ln_betas):
            h = jnp.tanh(h @ (w - w.T))
            mean = h.mean(-1, keepdims=True)
            var = ((h - mean) ** 2).mean(-1, keepdims=True)
            h = (h - mean) / jnp.sqrt(var + LN_EPS) * g + b
        dqdt = h @ (w_out - w_out.T)
        ham = 0.5 * jnp.sum(x ** 2, axis=1)
        return x + dqdt, ham

    pred_ref, ham_ref = ref_forward(x)
    assert jnp.allclose(predictions, pred_ref, atol=1e-4, rtol=1e-4)
    assert jnp.allclose(hamiltonian, ham_ref, atol=1e-4, rtol=1e-4)

    print("KERNEL_OK")
</pallas_src>

<mosaic_0001>
module attributes {stable_mosaic.version = 11 : i64} {
  func.func @_hnn_kernel(%arg0: i32, %arg1: memref<2x128xf32, #tpu.memory_space<vmem>>, %arg2: memref<2x128x128xf32, #tpu.memory_space<vmem>>, %arg3: memref<2x1x128xf32, #tpu.memory_space<vmem>>, %arg4: memref<2x1x128xf32, #tpu.memory_space<vmem>>, %arg5: memref<128x128xf32, #tpu.memory_space<vmem>>, %arg6: memref<128x128xf32, #tpu.memory_space<vmem>>, %arg7: memref<128x4xf32, #tpu.memory_space<vmem>>, %arg8: memref<2x128xf32, #tpu.memory_space<vmem>>, %arg9: memref<2x4xf32, #tpu.memory_space<vmem>>) attributes {dimension_semantics = [#tpu.dimension_semantics<parallel>], iteration_bounds = array<i64: 1>, scalar_prefetch = 0 : i64, scratch_operands = 0 : i64, tpu.core_type = #tpu.core_type<tc>, window_params = [{transform_indices = @transform_0, window_bounds = array<i64: 2, 128>}, {pipeline_mode = #tpu.pipeline_mode<synchronous>, transform_indices = @transform_1, window_bounds = array<i64: 2, 128, 128>}, {pipeline_mode = #tpu.pipeline_mode<synchronous>, transform_indices = @transform_2, window_bounds = array<i64: 2, 1, 128>}, {pipeline_mode = #tpu.pipeline_mode<synchronous>, transform_indices = @transform_3, window_bounds = array<i64: 2, 1, 128>}, {pipeline_mode = #tpu.pipeline_mode<synchronous>, transform_indices = @transform_4, window_bounds = array<i64: 128, 128>}, {pipeline_mode = #tpu.pipeline_mode<synchronous>, transform_indices = @transform_5, window_bounds = array<i64: 128, 128>}, {pipeline_mode = #tpu.pipeline_mode<synchronous>, transform_indices = @transform_6, window_bounds = array<i64: 128, 4>}, {transform_indices = @transform_7, window_bounds = array<i64: 2, 128>}, {transform_indices = @transform_8, window_bounds = array<i64: 2, 4>}]} {
    %c0 = arith.constant 0 : index
    %c0_0 = arith.constant 0 : index
    %0 = vector.load %arg1[%c0, %c0_0] : memref<2x128xf32, #tpu.memory_space<vmem>>, vector<2x128xf32>
    %1 = arith.mulf %0, %0 : vector<2x128xf32>
    %c0_1 = arith.constant 0 : index
    %c0_2 = arith.constant 0 : index
    %2 = vector.load %arg7[%c0_1, %c0_2] : memref<128x4xf32, #tpu.memory_space<vmem>>, vector<128x4xf32>
    %cst = arith.constant dense<0.000000e+00> : vector<2x4xf32>
    %3 = tpu.matmul %1, %2, %cst {dimension_numbers = #tpu.dot_dimension_numbers<[1], [0], [0], [1], [0, 0, 1, 1], [], []>} : vector<2x128xf32>, vector<128x4xf32>, vector<2x4xf32> -> vector<2x4xf32>
    %c0_3 = arith.constant 0 : index
    %c0_4 = arith.constant 0 : index
    %4 = vector.load %arg9[%c0_3, %c0_4] : memref<2x4xf32, #tpu.memory_space<vmem>>, vector<2x4xf32>
    tpu.vector_store %arg9[%c0_3, %c0_4], %3 {strides = array<i32>} : memref<2x4xf32, #tpu.memory_space<vmem>>, vector<2x4xf32>,
    %c0_5 = arith.constant 0 : index
    %c0_6 = arith.constant 0 : index
    %5 = vector.load %arg6[%c0_5, %c0_6] : memref<128x128xf32, #tpu.memory_space<vmem>>, vector<128x128xf32>
    %c0_7 = arith.constant 0 : index
    %c0_8 = arith.constant 0 : index
    %c0_9 = arith.constant 0 : index
    %6 = vector.load %arg2[%c0_7, %c0_8, %c0_9] : memref<2x128x128xf32, #tpu.memory_space<vmem>>, vector<1x128x128xf32>
    %7 = vector.shape_cast %6 : vector<1x128x128xf32> to vector<128x128xf32>
    %cst_10 = arith.constant dense<0.000000e+00> : vector<2x128xf32>
    %8 = tpu.matmul %0, %7, %cst_10 {dimension_numbers = #tpu.dot_dimension_numbers<[1], [0], [0], [1], [0, 0, 1, 1], [], []>} : vector<2x128xf32>, vector<128x128xf32>, vector<2x128xf32> -> vector<2x128xf32>
    %9 = math.tanh %8 : vector<2x128xf32>
    %cst_11 = arith.constant dense<0.000000e+00> : vector<2x128xf32>
    %10 = tpu.matmul %9, %5, %cst_11 {dimension_numbers = #tpu.dot_dimension_numbers<[1], [0], [0], [1], [0, 0, 1, 1], [], []>} : vector<2x128xf32>, vector<128x128xf32>, vector<2x128xf32> -> vector<2x128xf32>
    %11 = arith.mulf %9, %9 : vector<2x128xf32>
    %cst_12 = arith.constant dense<0.000000e+00> : vector<2x128xf32>
    %12 = tpu.matmul %11, %5, %cst_12 {dimension_numbers = #tpu.dot_dimension_numbers<[1], [0], [0], [1], [0, 0, 1, 1], [], []>} : vector<2x128xf32>, vector<128x128xf32>, vector<2x128xf32> -> vector<2x128xf32>
    %13 = arith.mulf %10, %10 : vector<2x128xf32>
    %14 = arith.subf %12, %13 : vector<2x128xf32>
    %cst_13 = arith.constant 9.99999974E-6 : f32
    %15 = vector.broadcast %cst_13 : f32 to vector<2x128xf32>
    %16 = arith.addf %14, %15 : vector<2x128xf32>
    %17 = math.rsqrt %16 : vector<2x128xf32>
    %18 = arith.subf %9, %10 : vector<2x128xf32>
    %19 = arith.mulf %18, %17 : vector<2x128xf32>
    %c0_14 = arith.constant 0 : index
    %c0_15 = arith.constant 0 : index
    %c0_16 = arith.constant 0 : index
    %20 = vector.load %arg3[%c0_14, %c0_15, %c0_16] : memref<2x1x128xf32, #tpu.memory_space<vmem>>, vector<1x1x128xf32>
    %21 = vector.shape_cast %20 : vector<1x1x128xf32> to vector<1x128xf32>
    %22 = vector.broadcast %21 : vector<1x128xf32> to vector<2x128xf32>
    %23 = arith.mulf %19, %22 : vector<2x128xf32>
    %c0_17 = arith.constant 0 : index
    %c0_18 = arith.constant 0 : index
    %c0_19 = arith.constant 0 : index
    %24 = vector.load %arg4[%c0_17, %c0_18, %c0_19] : memref<2x1x128xf32, #tpu.memory_space<vmem>>, vector<1x1x128xf32>
    %25 = vector.shape_cast %24 : vector<1x1x128xf32> to vector<1x128xf32>
    %26 = vector.broadcast %25 : vector<1x128xf32> to vector<2x128xf32>
    %27 = arith.addf %23, %26 : vector<2x128xf32>
    %c1 = arith.constant 1 : index
    %c0_20 = arith.constant 0 : index
    %c0_21 = arith.constant 0 : index
    %28 = vector.load %arg2[%c1, %c0_20, %c0_21] : memref<2x128x128xf32, #tpu.memory_space<vmem>>, vector<1x128x128xf32>
    %29 = vector.shape_cast %28 : vector<1x128x128xf32> to vector<128x128xf32>
    %cst_22 = arith.constant dense<0.000000e+00> : vector<2x128xf32>
    %30 = tpu.matmul %27, %29, %cst_22 {dimension_numbers = #tpu.dot_dimension_numbers<[1], [0], [0], [1], [0, 0, 1, 1], [], []>} : vector<2x128xf32>, vector<128x128xf32>, vector<2x128xf32> -> vector<2x128xf32>
    %31 = math.tanh %30 : vector<2x128xf32>
    %cst_23 = arith.constant dense<0.000000e+00> : vector<2x128xf32>
    %32 = tpu.matmul %31, %5, %cst_23 {dimension_numbers = #tpu.dot_dimension_numbers<[1], [0], [0], [1], [0, 0, 1, 1], [], []>} : vector<2x128xf32>, vector<128x128xf32>, vector<2x128xf32> -> vector<2x128xf32>
    %33 = arith.mulf %31, %31 : vector<2x128xf32>
    %cst_24 = arith.constant dense<0.000000e+00> : vector<2x128xf32>
    %34 = tpu.matmul %33, %5, %cst_24 {dimension_numbers = #tpu.dot_dimension_numbers<[1], [0], [0], [1], [0, 0, 1, 1], [], []>} : vector<2x128xf32>, vector<128x128xf32>, vector<2x128xf32> -> vector<2x128xf32>
    %35 = arith.mulf %32, %32 : vector<2x128xf32>
    %36 = arith.subf %34, %35 : vector<2x128xf32>
    %cst_25 = arith.constant 9.99999974E-6 : f32
    %37 = vector.broadcast %cst_25 : f32 to vector<2x128xf32>
    %38 = arith.addf %36, %37 : vector<2x128xf32>
    %39 = math.rsqrt %38 : vector<2x128xf32>
    %40 = arith.subf %31, %32 : vector<2x128xf32>
    %41 = arith.mulf %40, %39 : vector<2x128xf32>
    %c1_26 = arith.constant 1 : index
    %c0_27 = arith.constant 0 : index
    %c0_28 = arith.constant 0 : index
    %42 = vector.load %arg3[%c1_26, %c0_27, %c0_28] : memref<2x1x128xf32, #tpu.memory_space<vmem>>, vector<1x1x128xf32>
    %43 = vector.shape_cast %42 : vector<1x1x128xf32> to vector<1x128xf32>
    %44 = vector.broadcast %43 : vector<1x128xf32> to vector<2x128xf32>
    %45 = arith.mulf %41, %44 : vector<2x128xf32>
    %c1_29 = arith.constant 1 : index
    %c0_30 = arith.constant 0 : index
    %c0_31 = arith.constant 0 : index
    %46 = vector.load %arg4[%c1_29, %c0_30, %c0_31] : memref<2x1x128xf32, #tpu.memory_space<vmem>>, vector<1x1x128xf32>
    %47 = vector.shape_cast %46 : vector<1x1x128xf32> to vector<1x128xf32>
    %48 = vector.broadcast %47 : vector<1x128xf32> to vector<2x128xf32>
    %49 = arith.addf %45, %48 : vector<2x128xf32>
    %c0_32 = arith.constant 0 : index
    %c0_33 = arith.constant 0 : index
    %50 = vector.load %arg5[%c0_32, %c0_33] : memref<128x128xf32, #tpu.memory_space<vmem>>, vector<128x128xf32>
    %cst_34 = arith.constant dense<0.000000e+00> : vector<2x128xf32>
    %51 = tpu.matmul %49, %50, %cst_34 {dimension_numbers = #tpu.dot_dimension_numbers<[1], [0], [0], [1], [0, 0, 1, 1], [], []>} : vector<2x128xf32>, vector<128x128xf32>, vector<2x128xf32> -> vector<2x128xf32>
    %c0_35 = arith.constant 0 : index
    %c0_36 = arith.constant 0 : index
    %52 = vector.load %arg1[%c0_35, %c0_36] : memref<2x128xf32, #tpu.memory_space<vmem>>, vector<2x128xf32>
    %53 = arith.addf %52, %51 : vector<2x128xf32>
    %c0_37 = arith.constant 0 : index
    %c0_38 = arith.constant 0 : index
    %54 = vector.load %arg8[%c0_37, %c0_38] : memref<2x128xf32, #tpu.memory_space<vmem>>, vector<2x128xf32>
    tpu.vector_store %arg8[%c0_37, %c0_38], %53 {strides = array<i32>} : memref<2x128xf32, #tpu.memory_space<vmem>>, vector<2x128xf32>,
    return
  }
  func.func @transform_0(%arg0: i32) -> (i32, i32) {
    %c0_i32 = arith.constant 0 : i32
    %c0_i32_0 = arith.constant 0 : i32
    return %arg0, %c0_i32 : i32, i32
  }
  func.func @transform_1(%arg0: i32) -> (i32, i32, i32) {
    %c0_i32 = arith.constant 0 : i32
    %c0_i32_0 = arith.constant 0 : i32
    %c0_i32_1 = arith.constant 0 : i32
    %c0_i32_2 = arith.constant 0 : i32
    return %c0_i32, %c0_i32_0, %c0_i32_1 : i32, i32, i32
  }
  func.func @transform_2(%arg0: i32) -> (i32, i32, i32) {
    %c0_i32 = arith.constant 0 : i32
    %c0_i32_0 = arith.constant 0 : i32
    %c0_i32_1 = arith.constant 0 : i32
    %c0_i32_2 = arith.constant 0 : i32
    return %c0_i32, %c0_i32_0, %c0_i32_1 : i32, i32, i32
  }
  func.func @transform_3(%arg0: i32) -> (i32, i32, i32) {
    %c0_i32 = arith.constant 0 : i32
    %c0_i32_0 = arith.constant 0 : i32
    %c0_i32_1 = arith.constant 0 : i32
    %c0_i32_2 = arith.constant 0 : i32
    return %c0_i32, %c0_i32_0, %c0_i32_1 : i32, i32, i32
  }
  func.func @transform_4(%arg0: i32) -> (i32, i32) {
    %c0_i32 = arith.constant 0 : i32
    %c0_i32_0 = arith.constant 0 : i32
    %c0_i32_1 = arith.constant 0 : i32
    return %c0_i32, %c0_i32_0 : i32, i32
  }
  func.func @transform_5(%arg0: i32) -> (i32, i32) {
    %c0_i32 = arith.constant 0 : i32
    %c0_i32_0 = arith.constant 0 : i32
    %c0_i32_1 = arith.constant 0 : i32
    return %c0_i32, %c0_i32_0 : i32, i32
  }
  func.func @transform_6(%arg0: i32) -> (i32, i32) {
    %c0_i32 = arith.constant 0 : i32
    %c0_i32_0 = arith.constant 0 : i32
    %c0_i32_1 = arith.constant 0 : i32
    return %c0_i32, %c0_i32_0 : i32, i32
  }
  func.func @transform_7(%arg0: i32) -> (i32, i32) {
    %c0_i32 = arith.constant 0 : i32
    %c0_i32_0 = arith.constant 0 : i32
    return %arg0, %c0_i32 : i32, i32
  }
  func.func @transform_8(%arg0: i32) -> (i32, i32) {
    %c0_i32 = arith.constant 0 : i32
    %c0_i32_0 = arith.constant 0 : i32
    return %arg0, %c0_i32 : i32, i32
  }
}

</mosaic_0001>

<bundles_post_ra>
// kernel: tpu_custom_call.1
= control target key start
LH: loop header
LB: loop body
LE: loop exit
PB: predicated region body
PF: predicated region fallthrough
CT: control target
= control target key end

     0   :  { %14 = vsyncpa [#allocation3], 0  ;;  %s1863_s0 = inlined_call_operand.vmem [shape: f32[2,128], index: 0, kind: input, shape index: {}]   ;;  %s1864_s1 = inlined_call_operand.hbm [shape: f32[2,128,128], index: 1, kind: input, shape index: {}]   ;;  %s1865_s2 = inlined_call_operand.vmem [shape: f32[2,1,128], index: 2, kind: input, shape index: {}]   ;;  %s1866_s3 = inlined_call_operand.vmem [shape: f32[2,1,128], index: 3, kind: input, shape index: {}]   ;;  %s1867_s4 = inlined_call_operand.vmem [shape: f32[128,128], index: 4, kind: input, shape index: {}]   ;;  %s1868_s5 = inlined_call_operand.hbm [shape: f32[128,128], index: 5, kind: input, shape index: {}]   ;;  %s1869_s6 = inlined_call_operand.vmem [shape: f32[128,4], index: 6, kind: input, shape index: {}]   ;;  %s1870_s7 = inlined_call_operand.hbm [shape: f32[2,128], index: 7, kind: output, shape index: {0}]   ;;  %s1871_s8 = inlined_call_operand.hbm [shape: f32[2,4], index: 8, kind: output, shape index: {1}]  }
   0x1   :  { %15 = vsyncpa [#allocation6], 0 }
   0x2   :  { %16 = vsyncpa [#allocation4], 0 }
   0x3   :  { %17 = vsyncpa [#allocation9], 0  ;;  %s1513_s27 = smov [#allocation2]   ;;  %s1417_s9 = scalar_lea.hbm %s1864_s1, 4096 }
   0x4   :  { %s25_s28 = sshll.u32 %s1513_s27, 4  ;;  %p1418_p0 = scmp.ne.s32.totalorder %s1864_s1, %s1417_s9  ;;  %s26_s28 = int_to_ptr.vmem [resolvable:$true] %s25_s28 }
   0x5   :  { %p1421_p1 = scmp.lt.u32.totalorder %s1417_s9, %s1864_s1 }
   0x7   :  { %p1423_p2 = pnand %p1421_p1, %p1418_p0 }
   0x9   :  { %1426 = shalt.err (!%p1423_p2)
}
   0xa   :  { %s1427_s14 = scalar_lea.vmem %s26_s28, 4096  ;;  %p1432_p4 = scmp.lt.s32.totalorder %s26_s28, %s26_s28 }
   0xb   :  { %p1428_p3 = scmp.ne.s32.totalorder %s26_s28, %s1427_s14  ;;  %p1433_p5 = scmp.lt.s32.totalorder %s1427_s14, %s1427_s14 }
   0xd   :  { %p1434_p6 = por %p1433_p5, %p1432_p4 }
   0xf   :  { %p1435_p7 = pnand %p1434_p6, %p1428_p3 }
  0x11   :  { %1438 = shalt.err (!%p1435_p7)
}
  0x12   :  { %s1514_s15 = smov 128   ;;  %s1515_s16 = smov 8  }
  0x13   :  { %31 = dma.hbm_to_vmem [thread:$0]  %s1864_s1, 4096, %s26_s28, [#allocation3], %s1514_s15, %s1514_s15, %s1515_s16  }
  0x14   :  { %s1516_s19 = smov [#allocation5]   ;;  %s1439_s23 = scalar_lea.hbm %s1868_s5, 2048 }
  0x15   :  { %s43_s20 = sshll.u32 %s1516_s19, 4  ;;  %p1440_p8 = scmp.ne.s32.totalorder %s1868_s5, %s1439_s23  ;;  %s44_s20 = int_to_ptr.vmem [resolvable:$true] %s43_s20 }
  0x16   :  { %p1443_p9 = scmp.lt.u32.totalorder %s1439_s23, %s1868_s5 }
  0x18   :  { %p1445_p10 = pnand %p1443_p9, %p1440_p8 }
  0x1a   :  { %1448 = shalt.err (!%p1445_p10)
}
  0x1b   :  { %s1449_s29 = scalar_lea.vmem %s44_s20, 2048  ;;  %p1454_p12 = scmp.lt.s32.totalorder %s44_s20, %s44_s20 }
  0x1c   :  { %p1450_p11 = scmp.ne.s32.totalorder %s44_s20, %s1449_s29  ;;  %p1455_p13 = scmp.lt.s32.totalorder %s1449_s29, %s1449_s29 }
  0x1e   :  { %p1456_p0 = por %p1455_p13, %p1454_p12 }
  0x20   :  { %p1457_p1 = pnand %p1456_p0, %p1450_p11 }
  0x22   :  { %1460 = shalt.err (!%p1457_p1)
}
  0x23   :  { %49 = dma.hbm_to_vmem [thread:$0]  %s1868_s5, 2048, %s44_s20, [#allocation6], %s1514_s15, %s1514_s15, %s1515_s16  }
  0x24   :  { %1505 = dma.done.wait [#allocation3], 4096  }
  0x25   :  { %1506 = vsyncadd [#allocation3], 4294963200 }
  0x26   :  { %1507 = dma.done.wait [#allocation6], 2048  }
  0x27   :  { %1508 = vsyncadd [#allocation6], 4294965248  ;;  %v1517_v0 = vmov 0.0|0.0   ;;  %vm1518_vm0 = vmmov 0   ;;  %v1519_v1 = vmov 0.0   ;;  %v164_v2 = vld [vmem:[#allocation2] sm:$0xff] }
  0x28   :  { %1232 = vmatprep.subr.bf16.mxu1 %v1517_v0  ;;  %995 = vmatprep.mubr.msk.f32.mxu1 %vm1518_vm0, %v1519_v1  ;;  %v165_v3 = vld [vmem:[#allocation2 + $0x8] sm:$0xff]  ;;  %v166_v4 = vld [vmem:[#allocation2 + $0x10] sm:$0xff]  ;;  %v167_v6 = vld [vmem:[#allocation2 + $0x18] sm:$0xff]  ;;  %vm146_vm1 = vcmask 25600   ;;  %s1520_s28 = smov [#allocation8]  }
  0x29   :  { %1208 = vmatprep.subr.bf16.mxu0 %v1517_v0  ;;  %960 = vmatprep.mubr.msk.f32.mxu0 %vm1518_vm0, %v1519_v1  ;;  %v1233_v5 = vpack.c.bf16 %v165_v3, %v164_v2  ;;  %v1236_v7 = vpack.c.bf16 %v167_v6, %v166_v4  ;;  %v168_v8 = vld [vmem:[#allocation2 + $0x20] sm:$0xff]  ;;  %v169_v9 = vld [vmem:[#allocation2 + $0x28] sm:$0xff]  ;;  %v62_v12 = vld [vmem:[%s1869_s6 + $0x10] sm:$0xff]  ;;  %s772_s5 = sshll.u32 %s1520_s28, 4  ;;  %s773_s5 = int_to_ptr.vmem [resolvable:$true] %s772_s5 }
  0x2a   :  { %v60_v10 = vld [vmem:[%s1869_s6] sm:$0xff]  ;;  %v61_v11 = vld [vmem:[%s1869_s6 + $0x8] sm:$0xff]  ;;  %v63_v13 = vld [vmem:[%s1869_s6 + $0x18] sm:$0xff]  ;;  %v1239_v14 = vpack.c.bf16 %v169_v9, %v168_v8  ;;  %s1461_s30 = scalar_lea.vmem %s773_s5, 32  ;;  %p1466_p3 = scmp.lt.s32.totalorder %s773_s5, %s773_s5 }
  0x2b   :  { %1234 = vmatpush3.bf16.msra.mxu1 %v1233_v5  ;;  %v1209_v15 = vpack.c.bf16 %v61_v11, %v60_v10  ;;  %v170_v16 = vld [vmem:[#allocation2 + $0x30] sm:$0xff]  ;;  %v171_v17 = vld [vmem:[#allocation2 + $0x38] sm:$0xff]  ;;  %v1212_v18 = vpack.c.bf16 %v63_v13, %v62_v12  ;;  %v64_v19 = vld [vmem:[%s1869_s6 + $0x20] sm:$0xff]  ;;  %p1462_p2 = scmp.ne.s32.totalorder %s773_s5, %s1461_s30  ;;  %p1467_p4 = scmp.lt.s32.totalorder %s1461_s30, %s1461_s30 }
  0x2c   :  { %1235 = vmatprep.subr.bf16.mxu1 %v1517_v0  ;;  %v65_v20 = vld [vmem:[%s1869_s6 + $0x28] sm:$0xff]  ;;  %v1242_v21 = vpack.c.bf16 %v171_v17, %v170_v16  ;;  %v172_v22 = vld [vmem:[#allocation2 + $0x40] sm:$0xff]  ;;  %v66_v25 = vld [vmem:[%s1869_s6 + $0x30] sm:$0xff] }
  0x2d   :  { %1210 = vmatpush3.bf16.msra.mxu0 %v1209_v15  ;;  %v173_v23 = vld [vmem:[#allocation2 + $0x48] sm:$0xff]  ;;  %v1215_v24 = vpack.c.bf16 %v65_v20, %v64_v19  ;;  %v67_v26 = vld [vmem:[%s1869_s6 + $0x38] sm:$0xff]  ;;  %v174_v28 = vld [vmem:[#allocation2 + $0x50] sm:$0xff]  ;;  %p1468_p5 = por %p1467_p4, %p1466_p3 }
  0x2e   :  { %1211 = vmatprep.subr.bf16.mxu0 %v1517_v0  ;;  %v1245_v27 = vpack.c.bf16 %v173_v23, %v172_v22  ;;  %v175_v29 = vld [vmem:[#allocation2 + $0x58] sm:$0xff]  ;;  %v1218_v30 = vpack.c.bf16 %v67_v26, %v66_v25  ;;  %v68_v31 = vld [vmem:[%s1869_s6 + $0x40] sm:$0xff]  ;;  %v69_v32 = vld [vmem:[%s1869_s6 + $0x48] sm:$0xff] }
  0x2f   :  { %1237 = vmatpush3.bf16.msra.mxu1 %v1236_v7  ;;  %v1248_v33 = vpack.c.bf16 %v175_v29, %v174_v28  ;;  %v176_v34 = vld [vmem:[#allocation2 + $0x60] sm:$0xff]  ;;  %v177_v35 = vld [vmem:[#allocation2 + $0x68] sm:$0xff]  ;;  %v1221_v36 = vpack.c.bf16 %v69_v32, %v68_v31  ;;  %v70_v37 = vld [vmem:[%s1869_s6 + $0x50] sm:$0xff]  ;;  %p1469_p6 = pnand %p1468_p5, %p1462_p2 }
  0x30   :  { %1238 = vmatprep.subr.bf16.mxu1 %v1517_v0  ;;  %v71_v38 = vld [vmem:[%s1869_s6 + $0x58] sm:$0xff]  ;;  %v1251_v39 = vpack.c.bf16 %v177_v35, %v176_v34  ;;  %v178_v40 = vld [vmem:[#allocation2 + $0x70] sm:$0xff]  ;;  %v72_v43 = vld [vmem:[%s1869_s6 + $0x60] sm:$0xff] }
  0x31   :  { %1213 = vmatpush3.bf16.msra.mxu0 %v1212_v18  ;;  %v179_v41 = vld [vmem:[#allocation2 + $0x78] sm:$0xff]  ;;  %v1224_v42 = vpack.c.bf16 %v71_v38, %v70_v37  ;;  %v73_v44 = vld [vmem:[%s1869_s6 + $0x68] sm:$0xff]  ;;  %v74_v47 = vld [vmem:[%s1869_s6 + $0x70] sm:$0xff] }
  0x32   :  { %1214 = vmatprep.subr.bf16.mxu0 %v1517_v0  ;;  %v1254_v45 = vpack.c.bf16 %v179_v41, %v178_v40  ;;  %v1227_v46 = vpack.c.bf16 %v73_v44, %v72_v43  ;;  %v75_v48 = vld [vmem:[%s1869_s6 + $0x78] sm:$0xff]  ;;  %v148_v49 = vld [vmem:[#allocation5] sm:$0xff]  ;;  %v149_v50 = vld [vmem:[#allocation5 + $0x8] sm:$0xff] }
  0x33   :  { %1240 = vmatpush3.bf16.msra.mxu1 %v1239_v14  ;;  %v58_v51 = vld [vmem:[%s1863_s0] sm:$0x3]  ;;  %v1230_v52 = vpack.c.bf16 %v75_v48, %v74_v47  ;;  %v1662_v53 = vpack.c.bf16 %v149_v50, %v148_v49  ;;  %v150_v54 = vld [vmem:[#allocation5 + $0x10] sm:$0xff]  ;;  %v151_v55 = vld [vmem:[#allocation5 + $0x18] sm:$0xff] }
  0x34   :  { %1241 = vmatprep.subr.bf16.mxu1 %v1517_v0  ;;  %v59_v56 = vmul.f32 %v58_v51, %v58_v51  ;;  %v1669_v57 = vpack.c.bf16 %v151_v55, %v150_v54  ;;  %v152_v58 = vld [vmem:[#allocation5 + $0x20] sm:$0xff]  ;;  %v153_v59 = vld [vmem:[#allocation5 + $0x28] sm:$0xff]  ;;  %v154_v61 = vld [vmem:[#allocation5 + $0x30] sm:$0xff] }
  0x35   :  { %1216 = vmatpush3.bf16.msra.mxu0 %v1215_v24  ;;  %v1675_v60 = vpack.c.bf16 %v153_v59, %v152_v58  ;;  %v155_v62 = vld [vmem:[#allocation5 + $0x38] sm:$0xff]  ;;  %v156_v2 = vld [vmem:[#allocation5 + $0x40] sm:$0xff]  ;;  %v157_v3 = vld [vmem:[#allocation5 + $0x48] sm:$0xff] }
  0x36   :  { %1217 = vmatprep.subr.bf16.mxu0 %v1517_v0  ;;  %v1683_v63 = vpack.c.bf16 %v155_v62, %v154_v61  ;;  %v1689_v4 = vpack.c.bf16 %v157_v3, %v156_v2  ;;  %v158_v5 = vld [vmem:[#allocation5 + $0x50] sm:$0xff]  ;;  %v159_v6 = vld [vmem:[#allocation5 + $0x58] sm:$0xff]  ;;  %v160_v8 = vld [vmem:[#allocation5 + $0x60] sm:$0xff] }
  0x37   :  { %1243 = vmatpush3.bf16.msra.mxu1 %v1242_v21  ;;  %v1698_v7 = vpack.c.bf16 %v159_v6, %v158_v5  ;;  %v161_v9 = vld [vmem:[#allocation5 + $0x68] sm:$0xff]  ;;  %v162_v11 = vld [vmem:[#allocation5 + $0x70] sm:$0xff]  ;;  %v163_v12 = vld [vmem:[#allocation5 + $0x78] sm:$0xff] }
  0x38   :  { %1244 = vmatprep.subr.bf16.mxu1 %v1517_v0  ;;  %v1703_v10 = vpack.c.bf16 %v161_v9, %v160_v8  ;;  %v1708_v13 = vpack.c.bf16 %v163_v12, %v162_v11  ;;  %v415_v17 = vld [vmem:[#allocation2 + $0x80] sm:$0xff]  ;;  %v416_v18 = vld [vmem:[#allocation2 + $0x88] sm:$0xff]  ;;  %v417_v21 = vld [vmem:[#allocation2 + $0x90] sm:$0xff] }
  0x39   :  { %1219 = vmatpush3.bf16.msra.mxu0 %v1218_v30  ;;  %v1305_v20 = vpack.c.bf16 %v416_v18, %v415_v17  ;;  %v418_v22 = vld [vmem:[#allocation2 + $0x98] sm:$0xff]  ;;  %v419_v26 = vld [vmem:[#allocation2 + $0xa0] sm:$0xff]  ;;  %v421_v29 = vld [vmem:[#allocation2 + $0xb0] sm:$0xff] }
  0x3a   :  { %1220 = vmatprep.subr.bf16.mxu0 %v1517_v0  ;;  %v1308_v25 = vpack.c.bf16 %v418_v22, %v417_v21  ;;  %v422_v30 = vld [vmem:[#allocation2 + $0xb8] sm:$0xff]  ;;  %v423_v32 = vld [vmem:[#allocation2 + $0xc0] sm:$0xff]  ;;  %v425_v35 = vld [vmem:[#allocation2 + $0xd0] sm:$0xff] }
  0x3b   :  { %1246 = vmatpush3.bf16.msra.mxu1 %v1245_v27  ;;  %v420_v27 = vld [vmem:[#allocation2 + $0xa8] sm:$0xff]  ;;  %v1314_v31 = vpack.c.bf16 %v422_v30, %v421_v29  ;;  %v427_v38 = vld [vmem:[#allocation2 + $0xe0] sm:$0xff]  ;;  %v429_v41 = vld [vmem:[#allocation2 + $0xf0] sm:$0xff] }
  0x3c   :  { %1247 = vmatprep.subr.bf16.mxu1 %v1517_v0  ;;  %v1311_v28 = vpack.c.bf16 %v420_v27, %v419_v26  ;;  %v786_v54 = vld [vmem:[%s1865_s2] ss:$0 sm:$0xff]  ;;  %v668_v61 = vld [vmem:[%s1867_s4 + $0x8] sm:$0xff]  ;;  %v670_v2 = vld [vmem:[%s1867_s4 + $0x18] sm:$0xff] }
  0x3d   :  { %1222 = vmatpush3.bf16.msra.mxu0 %v1221_v36  ;;  %v426_v36 = vld [vmem:[#allocation2 + $0xd8] sm:$0xff]  ;;  %v671_v6 = vld [vmem:[%s1867_s4 + $0x20] sm:$0xff]  ;;  %v676_v12 = vld [vmem:[%s1867_s4 + $0x48] sm:$0xff] }
  0x3e   :  { %1223 = vmatprep.subr.bf16.mxu0 %v1517_v0  ;;  %v1320_v37 = vpack.c.bf16 %v426_v36, %v425_v35  ;;  %v674_v9 = vld [vmem:[%s1867_s4 + $0x38] sm:$0xff]  ;;  %v675_v11 = vld [vmem:[%s1867_s4 + $0x40] sm:$0xff]  ;;  %v680_v18 = vld [vmem:[%s1867_s4 + $0x68] sm:$0xff] }
  0x3f   :  { %1249 = vmatpush3.bf16.msra.mxu1 %v1248_v33  ;;  %v424_v33 = vld [vmem:[#allocation2 + $0xc8] sm:$0xff]  ;;  %v679_v17 = vld [vmem:[%s1867_s4 + $0x60] sm:$0xff]  ;;  %v682_v21 = vld [vmem:[%s1867_s4 + $0x78] sm:$0xff] }
  0x40   :  { %1250 = vmatprep.subr.bf16.mxu1 %v1517_v0  ;;  %v1317_v34 = vpack.c.bf16 %v424_v33, %v423_v32  ;;  %v789_v32 = vld [vmem:[%s1865_s2 + $0x1] ss:$0 sm:$0xff] }
  0x41   :  { %1225 = vmatpush3.bf16.msra.mxu0 %v1224_v42  ;;  %v430_v42 = vld [vmem:[#allocation2 + $0xf8] sm:$0xff] }
  0x42   :  { %1226 = vmatprep.subr.bf16.mxu0 %v1517_v0  ;;  %v1326_v43 = vpack.c.bf16 %v430_v42, %v429_v41 }
  0x43   :  { %1252 = vmatpush3.bf16.msra.mxu1 %v1251_v39  ;;  %v428_v39 = vld [vmem:[#allocation2 + $0xe8] sm:$0xff] }
  0x44   :  { %1253 = vmatprep.subr.bf16.mxu1 %v1517_v0  ;;  %v1323_v40 = vpack.c.bf16 %v428_v39, %v427_v38 }
  0x45   :  { %1228 = vmatpush3.bf16.msra.mxu0 %v1227_v46 }
  0x46   :  { %1229 = vmatprep.subr.bf16.mxu0 %v1517_v0 }
  0x47   :  { %1255 = vmatpush3.bf16.msra.mxu1 %v1254_v45 }
  0x48   :  { %1280 = vmatprep.subr.bf16.mxu1 %v1517_v0 }
  0x49   :  { %1231 = vmatpush3.bf16.msra.mxu0 %v1230_v52 }
  0x4a   :  { %996 = vmatmul.mubr.f32.vlgmr.msra.gmra.mrb[0].mxu1 %v58_v51  ;;  %1256 = vmatprep.subr.bf16.mxu0 %v1517_v0 }
  0x4b   :  { %1282 = vmatpush3.bf16.msra.mxu1 %v1662_v53  ;;  %1065 = vmatprep.mubr.msk.f32.mxu1 %vm1518_vm0, %v1519_v1 }
  0x4c   :  { %1283 = vmatprep.subr.bf16.mxu1 %v1517_v0  ;;  %961 = vmatmul.mubr.f32.vlgmr.msra.gmra.mrb[0].mxu0 %v59_v56  ;;  %v787_v56 = vld [vmem:[%s1866_s3] ss:$0 sm:$0xff] }
  0x4d   :  { %1258 = vmatpush3.bf16.msra.mxu0 %v1662_v53  ;;  %1030 = vmatprep.mubr.msk.f32.mxu0 %vm1518_vm0, %v1519_v1 }
  0x4e   :  { %1259 = vmatprep.subr.bf16.mxu0 %v1517_v0 }
  0x4f   :  { %1285 = vmatpush3.bf16.msra.mxu1 %v1669_v57 }
  0x50   :  { %1286 = vmatprep.subr.bf16.mxu1 %v1517_v0 }
  0x51   :  { %1261 = vmatpush3.bf16.msra.mxu0 %v1669_v57 }
  0x52   :  { %1262 = vmatprep.subr.bf16.mxu0 %v1517_v0 }
  0x53   :  { %1288 = vmatpush3.bf16.msra.mxu1 %v1675_v60 }
  0x54   :  { %1289 = vmatprep.subr.bf16.mxu1 %v1517_v0 }
  0x55   :  { %1264 = vmatpush3.bf16.msra.mxu0 %v1675_v60 }
  0x56   :  { %1265 = vmatprep.subr.bf16.mxu0 %v1517_v0 }
  0x57   :  { %1291 = vmatpush3.bf16.msra.mxu1 %v1683_v63 }
  0x58   :  { %1292 = vmatprep.subr.bf16.mxu1 %v1517_v0 }
  0x59   :  { %1267 = vmatpush3.bf16.msra.mxu0 %v1683_v63 }
  0x5a   :  { %1268 = vmatprep.subr.bf16.mxu0 %v1517_v0 }
  0x5b   :  { %1294 = vmatpush3.bf16.msra.mxu1 %v1689_v4 }
  0x5c   :  { %1295 = vmatprep.subr.bf16.mxu1 %v1517_v0 }
  0x5d   :  { %1270 = vmatpush3.bf16.msra.mxu0 %v1689_v4 }
  0x5e   :  { %1271 = vmatprep.subr.bf16.mxu0 %v1517_v0 }
  0x5f   :  { %1297 = vmatpush3.bf16.msra.mxu1 %v1698_v7 }
  0x60   :  { %1298 = vmatprep.subr.bf16.mxu1 %v1517_v0 }
  0x61   :  { %1273 = vmatpush3.bf16.msra.mxu0 %v1698_v7 }
  0x62   :  { %1274 = vmatprep.subr.bf16.mxu0 %v1517_v0 }
  0x63   :  { %1300 = vmatpush3.bf16.msra.mxu1 %v1703_v10 }
  0x64   :  { %1301 = vmatprep.subr.bf16.mxu1 %v1517_v0 }
  0x65   :  { %1276 = vmatpush3.bf16.msra.mxu0 %v1703_v10 }
  0x66   :  { %1277 = vmatprep.subr.bf16.mxu0 %v1517_v0 }
  0x67   :  { %1303 = vmatpush3.bf16.msra.mxu1 %v1708_v13 }
  0x68   :  { %1328 = vmatprep.subr.bf16.mxu1 %v1517_v0 }
  0x69   :  { %1279 = vmatpush3.bf16.msra.mxu0 %v1708_v13 }
  0x6a   :  { %1304 = vmatprep.subr.bf16.mxu0 %v1517_v0 }
 0x11d   :  { %v246_v14 = vpop.f32.mrb[0].mxu1 }
 0x11e   :  { %1409 = vtanh.f32 %v246_v14  ;;  %v997_v15 = vpop.f32.mrb[1].mxu1  ;;  %v677_v14 = vld [vmem:[%s1867_s4 + $0x50] sm:$0xff] }
 0x11f   :  { %v142_v16 = vpop.f32.mrb[0].mxu0  ;;  %v678_v15 = vld [vmem:[%s1867_s4 + $0x58] sm:$0xff] }
 0x120   :  { %v962_v19 = vpop.f32.mrb[1].mxu0  ;;  %147 = vst.msk [vmem:[#allocation8] sm:$0x3] %vm146_vm1, %v142_v16  ;;  %v1392_v16 = vpack.c.bf16 %v678_v15, %v677_v14 }
 0x121   :  { %v1395_v19 = vpack.c.bf16 %v680_v18, %v679_v17 }
 0x128   :  { %v1716_v23 = vpop.eup %1409 }
 0x129   :  { %1031 = vmatmul.mubr.f32.vlgmr.msra.gmra.mrb[2].mxu0 %v1716_v23  ;;  %v321_v24 = vmul.f32 %v1716_v23, %v1716_v23 }
 0x12a   :  { %1306 = vmatpush3.bf16.msra.mxu0 %v1305_v20  ;;  %1100 = vmatprep.mubr.msk.f32.mxu0 %vm1518_vm0, %v1519_v1  ;;  %v681_v20 = vld [vmem:[%s1867_s4 + $0x70] sm:$0xff] }
 0x12b   :  { %1066 = vmatmul.mubr.f32.vlgmr.msra.gmra.mrb[2].mxu1 %v321_v24  ;;  %1307 = vmatprep.subr.bf16.mxu0 %v1517_v0  ;;  %v1398_v22 = vpack.c.bf16 %v682_v21, %v681_v20 }
 0x12c   :  { %1330 = vmatpush3.bf16.msra.mxu1 %v1662_v53  ;;  %1135 = vmatprep.mubr.msk.f32.mxu1 %vm1518_vm0, %v1519_v1 }
 0x12d   :  { %1331 = vmatprep.subr.bf16.mxu1 %v1517_v0 }
 0x12e   :  { %1309 = vmatpush3.bf16.msra.mxu0 %v1308_v25 }
 0x12f   :  { %1310 = vmatprep.subr.bf16.mxu0 %v1517_v0 }
 0x130   :  { %1333 = vmatpush3.bf16.msra.mxu1 %v1669_v57 }
 0x131   :  { %1334 = vmatprep.subr.bf16.mxu1 %v1517_v0 }
 0x132   :  { %1312 = vmatpush3.bf16.msra.mxu0 %v1311_v28 }
 0x133   :  { %1313 = vmatprep.subr.bf16.mxu0 %v1517_v0 }
 0x134   :  { %1336 = vmatpush3.bf16.msra.mxu1 %v1675_v60 }
 0x135   :  { %1337 = vmatprep.subr.bf16.mxu1 %v1517_v0 }
 0x136   :  { %1315 = vmatpush3.bf16.msra.mxu0 %v1314_v31 }
 0x137   :  { %1316 = vmatprep.subr.bf16.mxu0 %v1517_v0 }
 0x138   :  { %1339 = vmatpush3.bf16.msra.mxu1 %v1683_v63 }
 0x139   :  { %1340 = vmatprep.subr.bf16.mxu1 %v1517_v0 }
 0x13a   :  { %1318 = vmatpush3.bf16.msra.mxu0 %v1317_v34 }
 0x13b   :  { %1319 = vmatprep.subr.bf16.mxu0 %v1517_v0 }
 0x13c   :  { %1342 = vmatpush3.bf16.msra.mxu1 %v1689_v4 }
 0x13d   :  { %1343 = vmatprep.subr.bf16.mxu1 %v1517_v0 }
 0x13e   :  { %1321 = vmatpush3.bf16.msra.mxu0 %v1320_v37 }
 0x13f   :  { %1322 = vmatprep.subr.bf16.mxu0 %v1517_v0 }
 0x140   :  { %1345 = vmatpush3.bf16.msra.mxu1 %v1698_v7 }
 0x141   :  { %1346 = vmatprep.subr.bf16.mxu1 %v1517_v0 }
 0x142   :  { %1324 = vmatpush3.bf16.msra.mxu0 %v1323_v40 }
 0x143   :  { %1325 = vmatprep.subr.bf16.mxu0 %v1517_v0 }
 0x144   :  { %1348 = vmatpush3.bf16.msra.mxu1 %v1703_v10 }
 0x145   :  { %1349 = vmatprep.subr.bf16.mxu1 %v1517_v0 }
 0x146   :  { %1327 = vmatpush3.bf16.msra.mxu0 %v1326_v43 }
 0x147   :  { %1352 = vmatprep.subr.bf16.mxu0 %v1517_v0 }
 0x148   :  { %1351 = vmatpush3.bf16.msra.mxu1 %v1708_v13 }
 0x149   :  { %1376 = vmatprep.subr.bf16.mxu1 %v1517_v0 }
 0x1fc   :  { %v317_v44 = vpop.f32.mrb[2].mxu0 }
 0x1fd   :  { %v392_v45 = vmul.f32 %v317_v44, %v317_v44  ;;  %v1032_v46 = vpop.f32.mrb[3].mxu0  ;;  %v396_v51 = vsub.f32 %v1716_v23, %v317_v44 }
 0x1fe   :  { %v388_v47 = vpop.f32.mrb[2].mxu1 }
 0x1ff   :  { %v393_v48 = vsub.f32 %v388_v47, %v392_v45  ;;  %v1067_v49 = vpop.f32.mrb[3].mxu1 }
 0x201   :  { %v394_v50 = vadd.f32 1e-05, %v393_v48 }
 0x203   :  { %1411 = vrsqrt.f32 %v394_v50 }
 0x20d   :  { %v1412_v52 = vpop.eup %1411 }
 0x20e   :  { %v397_v55 = vmul.f32 %v1412_v52, %v396_v51 }
 0x210   :  { %v405_v58 = vmul.f32 %v786_v54, %v397_v55 }
 0x212   :  { %v413_v59 = vadd.f32 %v787_v56, %v405_v58 }
 0x214   :  { %1101 = vmatmul.mubr.f32.vlgmr.msra.gmra.mrb[4].mxu0 %v413_v59 }
 0x215   :  { %1354 = vmatpush3.bf16.msra.mxu0 %v1662_v53  ;;  %1170 = vmatprep.mubr.msk.f32.mxu0 %vm1518_vm0, %v1519_v1 }
 0x216   :  { %1355 = vmatprep.subr.bf16.mxu0 %v1517_v0 }
 0x219   :  { %1357 = vmatpush3.bf16.msra.mxu0 %v1669_v57 }
 0x21a   :  { %1358 = vmatprep.subr.bf16.mxu0 %v1517_v0 }
 0x21d   :  { %1360 = vmatpush3.bf16.msra.mxu0 %v1675_v60  ;;  %v667_v60 = vld [vmem:[%s1867_s4] sm:$0xff] }
 0x21e   :  { %1361 = vmatprep.subr.bf16.mxu0 %v1517_v0  ;;  %v1377_v62 = vpack.c.bf16 %v668_v61, %v667_v60 }
 0x221   :  { %1363 = vmatpush3.bf16.msra.mxu0 %v1683_v63  ;;  %v669_v63 = vld [vmem:[%s1867_s4 + $0x10] sm:$0xff] }
 0x222   :  { %1364 = vmatprep.subr.bf16.mxu0 %v1517_v0  ;;  %v1380_v5 = vpack.c.bf16 %v670_v2, %v669_v63 }
 0x225   :  { %1366 = vmatpush3.bf16.msra.mxu0 %v1689_v4 }
 0x226   :  { %1367 = vmatprep.subr.bf16.mxu0 %v1517_v0 }
 0x229   :  { %1369 = vmatpush3.bf16.msra.mxu0 %v1698_v7  ;;  %v672_v7 = vld [vmem:[%s1867_s4 + $0x28] sm:$0xff] }
 0x22a   :  { %1370 = vmatprep.subr.bf16.mxu0 %v1517_v0  ;;  %v1383_v8 = vpack.c.bf16 %v672_v7, %v671_v6 }
 0x22d   :  { %1372 = vmatpush3.bf16.msra.mxu0 %v1703_v10 }
 0x22e   :  { %1373 = vmatprep.subr.bf16.mxu0 %v1517_v0 }
 0x231   :  { %1375 = vmatpush3.bf16.msra.mxu0 %v1708_v13  ;;  %v1389_v13 = vpack.c.bf16 %v676_v12, %v675_v11 }
 0x2e7   :  { %v497_v53 = vpop.f32.mrb[4].mxu0 }
 0x2e8   :  { %1413 = vtanh.f32 %v497_v53  ;;  %v1102_v57 = vpop.f32.mrb[5].mxu0 }
 0x2f2   :  { %v1414_v3 = vpop.eup %1413 }
 0x2f3   :  { %1136 = vmatmul.mubr.f32.vlgmr.msra.gmra.mrb[4].mxu1 %v1414_v3  ;;  %v572_v4 = vmul.f32 %v1414_v3, %v1414_v3 }
 0x2f4   :  { %1378 = vmatpush3.bf16.msra.mxu1 %v1377_v62  ;;  %1205 = vmatprep.mubr.msk.f32.mxu1 %vm1518_vm0, %v1519_v1  ;;  %v673_v1 = vld [vmem:[%s1867_s4 + $0x30] sm:$0xff] }
 0x2f5   :  { %1171 = vmatmul.mubr.f32.vlgmr.msra.gmra.mrb[6].mxu0 %v572_v4  ;;  %1379 = vmatprep.subr.bf16.mxu1 %v1517_v0  ;;  %v1386_v10 = vpack.c.bf16 %v674_v9, %v673_v1 }
 0x2f8   :  { %1381 = vmatpush3.bf16.msra.mxu1 %v1380_v5 }
 0x2f9   :  { %1382 = vmatprep.subr.bf16.mxu1 %v1517_v0 }
 0x2fc   :  { %1384 = vmatpush3.bf16.msra.mxu1 %v1383_v8 }
 0x2fd   :  { %1385 = vmatprep.subr.bf16.mxu1 %v1517_v0 }
 0x300   :  { %1387 = vmatpush3.bf16.msra.mxu1 %v1386_v10 }
 0x301   :  { %1388 = vmatprep.subr.bf16.mxu1 %v1517_v0 }
 0x304   :  { %1390 = vmatpush3.bf16.msra.mxu1 %v1389_v13 }
 0x305   :  { %1391 = vmatprep.subr.bf16.mxu1 %v1517_v0 }
 0x308   :  { %1393 = vmatpush3.bf16.msra.mxu1 %v1392_v16 }
 0x309   :  { %1394 = vmatprep.subr.bf16.mxu1 %v1517_v0 }
 0x30c   :  { %1396 = vmatpush3.bf16.msra.mxu1 %v1395_v19 }
 0x30d   :  { %1397 = vmatprep.subr.bf16.mxu1 %v1517_v0  ;;  %v791_v0 = vld [vmem:[%s1866_s3 + $0x1] ss:$0 sm:$0xff] }
 0x310   :  { %1399 = vmatpush3.bf16.msra.mxu1 %v1398_v22 }
 0x3c6   :  { %v568_v23 = vpop.f32.mrb[4].mxu1 }
 0x3c7   :  { %v643_v24 = vmul.f32 %v568_v23, %v568_v23  ;;  %v1137_v25 = vpop.f32.mrb[5].mxu1  ;;  %v647_v30 = vsub.f32 %v1414_v3, %v568_v23 }
 0x3c8   :  { %v639_v26 = vpop.f32.mrb[6].mxu0 }
 0x3c9   :  { %v644_v27 = vsub.f32 %v639_v26, %v643_v24  ;;  %v1172_v28 = vpop.f32.mrb[7].mxu0 }
 0x3cb   :  { %v645_v29 = vadd.f32 1e-05, %v644_v27 }
 0x3cd   :  { %1415 = vrsqrt.f32 %v645_v29 }
 0x3d7   :  { %v1416_v31 = vpop.eup %1415 }
 0x3d8   :  { %v648_v33 = vmul.f32 %v1416_v31, %v647_v30 }
 0x3da   :  { %v657_v34 = vmul.f32 %v789_v32, %v648_v33 }
 0x3dc   :  { %v666_v35 = vadd.f32 %v791_v0, %v657_v34 }
 0x3de   :  { %1206 = vmatmul.mubr.f32.vlgmr.msra.gmra.mrb[6].mxu1 %v666_v35 }
 0x3df   :  { %1472 = shalt.err (!%p1469_p6)
}
 0x3e0   :  { %s1473_s10 = scalar_lea.hbm %s1871_s8, 32 }
 0x3e1   :  { %p1474_p7 = scmp.ne.s32.totalorder %s1871_s8, %s1473_s10  ;;  %p1477_p8 = scmp.lt.u32.totalorder %s1473_s10, %s1871_s8 }
 0x3e3   :  { %p1479_p9 = pnand %p1477_p8, %p1474_p7 }
 0x3e5   :  { %1482 = shalt.err (!%p1479_p9)
}
 0x3e6   :  { %775 = dma.vmem_to_hbm [thread:$0]  %s773_s5, 32, %s1871_s8, [#allocation9]   ;;  %v753_v36 = vld [vmem:[%s1863_s0] sm:$0x3] }
 0x3e7   :  { %s1521_s17 = smov [#allocation7]  }
 0x3e8   :  { %s762_s18 = sshll.u32 %s1521_s17, 4  ;;  %s763_s18 = int_to_ptr.vmem [resolvable:$true] %s762_s18 }
 0x3e9   :  { %s1483_s19 = scalar_lea.vmem %s763_s18, 32  ;;  %p1488_p11 = scmp.lt.s32.totalorder %s763_s18, %s763_s18 }
 0x3ea   :  { %p1484_p10 = scmp.ne.s32.totalorder %s763_s18, %s1483_s19  ;;  %p1489_p12 = scmp.lt.s32.totalorder %s1483_s19, %s1483_s19 }
 0x3ec   :  { %p1490_p13 = por %p1489_p12, %p1488_p11 }
 0x3ee   :  { %p1491_p0 = pnand %p1490_p13, %p1484_p10 }
 0x4b1   :  { %v749_v37 = vpop.f32.mrb[6].mxu1 }
 0x4b2   :  { %v754_v38 = vadd.f32 %v753_v36, %v749_v37  ;;  %v1207_v39 = vpop.f32.mrb[7].mxu1 }
 0x4b4   :  { %755 = vst [vmem:[#allocation7] sm:$0x3] %v754_v38 }
 0x4b5   :  { %1494 = shalt.err (!%p1491_p0)
}
 0x4b6   :  { %s1495_s21 = scalar_lea.hbm %s1870_s7, 32 }
 0x4b7   :  { %p1496_p1 = scmp.ne.s32.totalorder %s1870_s7, %s1495_s21  ;;  %p1499_p2 = scmp.lt.u32.totalorder %s1495_s21, %s1870_s7 }
 0x4b9   :  { %p1501_p3 = pnand %p1499_p2, %p1496_p1 }
 0x4bb   :  { %1504 = shalt.err (!%p1501_p3)
}
 0x4bc   :  { %765 = dma.vmem_to_hbm [thread:$0]  %s763_s18, 32, %s1870_s7, [#allocation4]  }
 0x4bd   :  { %1509 = dma.done.wait [#allocation4], 32  }
 0x4be   :  { %1510 = vsyncadd [#allocation4], 4294967264 }
 0x4bf   :  { %1511 = dma.done.wait [#allocation9], 32  }
 0x4c0   :  { %1512 = vsyncadd [#allocation9], 4294967264 }
 0x4c1   :  { %782 = vsyncpa [#allocation3], 1 }
 0x4c2   :  { %783 = vsyncpa [#allocation6], 1 }
 0x4c3   :  { %784 = vsyncpa [#allocation4], 1 }
 0x4c4   :  { %785 = vsyncpa [#allocation9], 1 }

</bundles_post_ra>
